<compile_context>
chip_gen: v7x
topology: tpu7x:2x2x1
jax: 0.10.0
libtpu: 0.0.40
codegen_flags: <defaults>
</compile_context>

<pallas_src>
import jax
import jax.numpy as jnp
from jax.experimental import pallas as pl
from jax.experimental.pallas import tpu as pltpu

LANE = 128


def _inv1x1_kernel(w_ref, x_ref, z_ref):
    # w_ref: (C, C) resident weight; x_ref/z_ref: (C, T_BLK) tiles (batch squeezed).
    # One plain 2-D MXU matmul per tile; accumulate in f32 regardless of dtype.
    z_ref[...] = jnp.dot(
        w_ref[...], x_ref[...], preferred_element_type=jnp.float32
    ).astype(z_ref.dtype)


def invertible_1x1_conv_forward(x, W, *, t_blk_max=1 << 16, vmem_tile_budget=4 << 20):
    """Equivalent of Invertible1x1Convolution.forward(x, reverse=False).

    Returns (z, log_det_W) where z = conv1d(x, W[..., None]) and
    log_det_W = batch_size * n_of_groups * logdet(W)  (NaN if det(W) <= 0,
    matching torch.logdet semantics).
    """
    B, C, T = x.shape
    itemsize = jnp.dtype(x.dtype).itemsize

    # Keep W in the activation dtype (halves W-side width for bf16 activations);
    # the MXU still accumulates in f32 via preferred_element_type.
    # (Small deviation from PyTorch param precision when activations are bf16.)
    W_k = W.astype(x.dtype)

    # ---- tile sizing: T_BLK is the sole knob (batch is a squeezed grid axis) ----
    # ~4 MiB per x tile (z tile same size) => x+z double-buffered <= ~16 MiB.
    t_cap = max(LANE, (vmem_tile_budget // max(1, C * itemsize)) // LANE * LANE)
    T_BLK = min(t_blk_max, t_cap)
    if T <= T_BLK:
        T_BLK = T  # single full-extent block along T (always a legal block shape)

    # Ragged last T block is handled by Pallas (masked store on that block only).
    grid = (B, pl.cdiv(T, T_BLK))

    # Explicit scoped-VMEM budget: >= 32 MiB keeps the big-tile win on v5e
    # (16 MiB scoped default); <= 64 MiB stays inside v7x physical VMEM.
    tile_bytes = C * T_BLK * itemsize
    vmem_limit = int(
        min(64 << 20, max(32 << 20, 4 * tile_bytes + C * C * itemsize + (2 << 20)))
    )

    cost = pl.CostEstimate(
        flops=2 * B * C * C * T,
        transcendentals=0,
        bytes_accessed=2 * B * C * T * itemsize + C * C * itemsize,
    )

    z = pl.pallas_call(
        _inv1x1_kernel,
        out_shape=jax.ShapeDtypeStruct((B, C, T), x.dtype),
        grid_spec=pltpu.PrefetchScalarGridSpec(
            num_scalar_prefetch=0,
            grid=grid,
            in_specs=[
                pl.BlockSpec((C, C), lambda b, t: (0, 0)),               # W, resident
                pl.BlockSpec((None, C, T_BLK), lambda b, t: (b, 0, t)),  # x tile, batch squeezed
            ],
            out_specs=pl.BlockSpec((None, C, T_BLK), lambda b, t: (b, 0, t)),
        ),
        compiler_params=pltpu.CompilerParams(
            dimension_semantics=("parallel", "parallel"),
            vmem_limit_bytes=vmem_limit,
        ),
        cost_estimate=cost,
    )(W_k, x)

    # log_det_W: tiny CxC parameter-side glue (matches torch.logdet: NaN if det <= 0).
    sign, logabsdet = jnp.linalg.slogdet(W.astype(jnp.float32))
    log_det = jnp.where(sign > 0, logabsdet, jnp.nan)
    log_det_W = (B * T) * log_det

    # TODO(synk): reverse branch (F.conv1d with W_inverse, padding=1) not kernelized;
    # only the forward (training) path is implemented here.
    return z, log_det_W


def make_weight(key, channels):
    """Deterministic re-implementation of the module's __init__ weight construction."""
    A = jax.random.normal(key, (channels, channels), dtype=jnp.float32)
    Q, _ = jnp.linalg.qr(A)
    det = jnp.linalg.det(Q)
    sign = jnp.where(det < 0, -1.0, 1.0)
    W = Q.at[:, 0].multiply(sign)  # flip first column if det < 0
    return W


if __name__ == "__main__":
    key = jax.random.PRNGKey(0)
    k_w, k_x, k_x2 = jax.random.split(key, 3)

    # Test 1: batch=2, channels=8, n_of_groups (time)=200.
    # T=200 is deliberately not a multiple of 128: single full-extent T block.
    B, C, T = 2, 8, 200
    W = make_weight(k_w, C)
    x = jax.random.normal(k_x, (B, C, T), dtype=jnp.float32)

    z, log_det_W = invertible_1x1_conv_forward(x, W)
    z = jax.block_until_ready(z)
    log_det_W = jax.block_until_ready(log_det_W)

    z_ref = jnp.einsum("oc,bct->bot", W, x)
    ld_ref = (B * T) * jnp.log(jnp.linalg.det(W))  # det(W) > 0 by construction
    assert z.shape == (B, C, T)
    assert log_det_W.shape == ()
    assert jnp.allclose(z, z_ref, atol=1e-5, rtol=1e-5), "z mismatch vs reference"
    assert jnp.allclose(log_det_W, ld_ref, atol=1e-3, rtol=1e-5), "logdet mismatch"

    # Test 2: exercise the multi-tile ragged-T path (cdiv grid, masked last block)
    # by forcing a small T_BLK.
    B2, C2, T2 = 2, 8, 384
    x2 = jax.random.normal(k_x2, (B2, C2, T2), dtype=jnp.float32)
    z2, _ = invertible_1x1_conv_forward(x2, W, t_blk_max=256)
    z2 = jax.block_until_ready(z2)
    z2_ref = jnp.einsum("oc,bct->bot", W, x2)
    assert jnp.allclose(z2, z2_ref, atol=1e-5, rtol=1e-5), "ragged-T z mismatch"

    print("KERNEL_OK")
</pallas_src>

<mosaic_0001>
module attributes {stable_mosaic.version = 11 : i64} {
  func.func @_inv1x1_kernel(%arg0: i32, %arg1: i32, %arg2: memref<8x8xf32, #tpu.memory_space<vmem>>, %arg3: memref<1x8x200xf32, #tpu.memory_space<vmem>>, %arg4: memref<1x8x200xf32, #tpu.memory_space<vmem>>) attributes {dimension_semantics = [#tpu.dimension_semantics<parallel>, #tpu.dimension_semantics<parallel>], iteration_bounds = array<i64: 2, 1>, scalar_prefetch = 0 : i64, scratch_operands = 0 : i64, tpu.core_type = #tpu.core_type<tc>, window_params = [{pipeline_mode = #tpu.pipeline_mode<synchronous>, transform_indices = @transform_0, window_bounds = array<i64: 8, 8>}, {transform_indices = @transform_1, window_bounds = array<i64: 1, 8, 200>}, {transform_indices = @transform_2, window_bounds = array<i64: 1, 8, 200>}]} {
    %c0 = arith.constant 0 : index
    %c0_0 = arith.constant 0 : index
    %0 = vector.load %arg2[%c0, %c0_0] : memref<8x8xf32, #tpu.memory_space<vmem>>, vector<8x8xf32>
    %c0_1 = arith.constant 0 : index
    %c0_2 = arith.constant 0 : index
    %c0_3 = arith.constant 0 : index
    %1 = vector.load %arg3[%c0_1, %c0_2, %c0_3] : memref<1x8x200xf32, #tpu.memory_space<vmem>>, vector<1x8x200xf32>
    %2 = vector.shape_cast %1 : vector<1x8x200xf32> to vector<8x200xf32>
    %cst = arith.constant dense<0.000000e+00> : vector<8x200xf32>
    %3 = tpu.matmul %0, %2, %cst {dimension_numbers = #tpu.dot_dimension_numbers<[1], [0], [0], [1], [0, 0, 1, 1], [], []>} : vector<8x8xf32>, vector<8x200xf32>, vector<8x200xf32> -> vector<8x200xf32>
    %c0_4 = arith.constant 0 : index
    %c0_5 = arith.constant 0 : index
    %c0_6 = arith.constant 0 : index
    %4 = vector.load %arg4[%c0_4, %c0_5, %c0_6] : memref<1x8x200xf32, #tpu.memory_space<vmem>>, vector<1x8x200xf32>
    %5 = vector.shape_cast %4 : vector<1x8x200xf32> to vector<8x200xf32>
    %6 = vector.shape_cast %3 : vector<8x200xf32> to vector<1x8x200xf32>
    tpu.vector_store %arg4[%c0_4, %c0_5, %c0_6], %6 {strides = array<i32>} : memref<1x8x200xf32, #tpu.memory_space<vmem>>, vector<1x8x200xf32>,
    return
  }
  func.func @transform_0(%arg0: i32, %arg1: i32) -> (i32, i32) {
    %c0_i32 = arith.constant 0 : i32
    %c0_i32_0 = arith.constant 0 : i32
    %c0_i32_1 = arith.constant 0 : i32
    return %c0_i32, %c0_i32_0 : i32, i32
  }
  func.func @transform_1(%arg0: i32, %arg1: i32) -> (i32, i32, i32) {
    %c0_i32 = arith.constant 0 : i32
    %c0_i32_0 = arith.constant 0 : i32
    return %arg0, %c0_i32, %arg1 : i32, i32, i32
  }
  func.func @transform_2(%arg0: i32, %arg1: i32) -> (i32, i32, i32) {
    %c0_i32 = arith.constant 0 : i32
    %c0_i32_0 = arith.constant 0 : i32
    return %arg0, %c0_i32, %arg1 : i32, i32, i32
  }
}

</mosaic_0001>

<bundles_post_ra>
// kernel: tpu_custom_call.1
= control target key start
LH: loop header
LB: loop body
LE: loop exit
PB: predicated region body
PF: predicated region fallthrough
CT: control target
= control target key end

     0   :  { %7 = vsyncpa [#allocation3], 0  ;;  %s862_s0 = inlined_call_operand.hbm [shape: f32[8,8], index: 0, kind: input, shape index: {}]   ;;  %s863_s1 = inlined_call_operand.hbm [shape: f32[2,8,200], index: 1, kind: input, shape index: {}]   ;;  %s864_s2 = inlined_call_operand.hbm [shape: f32[2,8,200], index: 2, kind: output, shape index: {}]  }
   0x1   :  { %8 = vsyncpa [#allocation6], 0 }
   0x2   :  { %10 = vsyncpa [#allocation6 + $0x1], 0 }
   0x3   :  { %11 = vsyncpa [#allocation4], 0 }
   0x4   :  { %13 = vsyncpa [#allocation4 + $0x1], 0  ;;  %s646_s9 = smov 0   ;;  %s648_s10 = smov 0  }
   0x5   :  { %s650_s11 = smov 0   ;;  %s652_s12 = smov 0  }
   0x6   :  { %s654_s13 = smov 0   ;;  %s656_s14 = smov 0  }
   0x7 LB: > { %s387_s15 = sadd.s32 4294967295, %s625_s14   ;;  %s388_s16 = sadd.s32 4294967294, %s625_s14   ;;  %s625_s14 = sphi %s656_s14, %s19_s14   ;;  %s621_s13 = sphi %s654_s13, %s889_s13   ;;  %s617_s12 = sphi %s652_s12, %s888_s12   ;;  %s613_s11 = sphi %s650_s11, %s887_s11   ;;  %s609_s10 = sphi %s648_s10, %s886_s10   ;;  %s605_s9 = sphi %s646_s9, %s885_s9  }
   0x8   : > { %p74_p0 = scmp.ne.s32.totalorder %s609_s10, %s605_s9  ;;  %p680_p1 = scmp.eq.s32.totalorder %s387_s15, 0 }
   0x9   : > { %p684_p2 = scmp.eq.s32.totalorder %s387_s15, 1  ;;  %p106_p3 = scmp.eq.s32.totalorder %s388_s16, 1 }
   0xa   : > { %s869_s17 = scalar_select %p680_p1, 1, 0 }
   0xb   : > { %s870_s18 = scalar_select %p684_p2, 1, 0 }
   0xc   : > { %p690_p4 = por %p680_p1, %p74_p0  ;;  %p389_p5 = scmp.ge.s32.totalorder %s625_s14, 1 }
   0xd   : > { %p695_p6 = por %p106_p3, %p74_p0  ;;  %p113_p7 = scmp.lt.s32.totalorder %s625_s14, 3 }
   0xe   : > { %s871_s19 = scalar_select %p690_p4, 1, 0 }
   0xf   : > { %s872_s20 = scalar_select %p695_p6, 1, 0 }
  0x10   : > { %p700_p8 = pnand %p389_p5, %p113_p7  ;;  %s627_s22 = smov [#allocation2]  }
  0x11   : > { %s126_s23 = sshll.u32 %s627_s22, 4  ;;  %s31_s25 = sadd.s32 1, %s621_s13  ;;  %s127_s23 = int_to_ptr.vmem [resolvable:$true] %s126_s23 }
  0x12   : > { %s873_s21 = scalar_select %p700_p8, 1, 0 }
  0x13   : > { %p415_p10 = pneg %p700_p8  ;;  %s61_s26 = sadd.s32 1, %s613_s11 }
  0x14   : > { %p715_p12 = scmp.ge.s32.totalorder %s31_s25, 2  ;;  %s481_s30 = scalar_lea.hbm %s862_s0, 128 }
  0x15   : > { %p709_p11 = pnand %p415_p10, %p680_p1  ;;  %p482_p13 = scmp.ne.s32.totalorder %s862_s0, %s481_s30 }
  0x16   : > { %s875_s27 = scalar_select %p715_p12, 1, 0 }
  0x17   : > { %p483_p0 = pneg %p709_p11  ;;  %p488_p7 = scmp.lt.u32.totalorder %s481_s30, %s862_s0 }
  0x19   : > { %p484_p3 = pnand %p483_p0, %p482_p13 }
  0x1b   : > { %p485_p5 = pneg %p484_p3 }
  0x1d   : > { %p490_p10 = pnand %p488_p7, %p485_p5 }
  0x1f   : > { %493 = shalt.err (!%p490_p10)
}
  0x20   : > { %s494_s7 = scalar_lea.vmem %s127_s23, 128  ;;  %p502_p1 = scmp.lt.s32.totalorder %s127_s23, %s127_s23 }
  0x21   : > { %p495_p9 = scmp.ne.s32.totalorder %s127_s23, %s494_s7  ;;  %p503_p8 = scmp.lt.s32.totalorder %s494_s7, %s494_s7 }
  0x23   : > { %p497_p6 = pnand %p495_p9, %p483_p0  ;;  %p504_p2 = por %p503_p8, %p502_p1 }
  0x25   : > { %p498_p4 = pneg %p497_p6 }
  0x27   : > { %p505_p12 = pnand %p504_p2, %p498_p4 }
  0x29   : > { %508 = shalt.err (!%p505_p12)
}
  0x2a   : > { %418 = dma.hbm_to_vmem [thread:$0]  (!%p709_p11), %s862_s0, 128, %s127_s23, [#allocation3]  }
  0x2b   : > { %p876_p1 = scmp.ne.s32.totalorder %s875_s27, 0  ;;  %p68_p2 = scmp.ne.s32.totalorder %s613_s11, %s609_s10 }
  0x2c   : > { %p69_p4 = scmp.eq.s32.totalorder %s625_s14, 0  ;;  %p428_p6 = scmp.lt.s32.totalorder %s625_s14, 2 }
  0x2d   : > { %s891_s25 = smov (%p876_p1, %s31_s25), 0  ;;  %p877_p12 = scmp.ne.s32.totalorder %s870_s18, 0 }
  0x2e   : > { %s56_s16 = ssub.s32 %s621_s13, %s891_s25  ;;  %p70_p9 = por %p69_p4, %p68_p2 }
  0x2f   : > { %p59_p8 = scmp.eq.s32.totalorder %s56_s16, 0  ;;  %p747_p13 = por %p877_p12, %p68_p2 }
  0x30   : > { %s137_s24 = sand.u32 1, %s613_s11   ;;  %s405_s27 = sshll.u32 %s621_s13, 8 }
  0x31   : > { %s755_s28 = scalar_select %p59_p8, %s613_s11, %s61_s26  }
  0x32   : > { %s392_s23 = sshll.u32 %s137_s24, 4  ;;  %s761_s3 = scalar_lea.hbm %s863_s1, %s405_s27 }
  0x33   : > { %s141_s18 = scalar_lea.vmem [#allocation5], %s392_s23  ;;  %p765_p11 = pnand %p428_p6, %p70_p9 }
  0x34   : > { %s151_s4 = sshll.u32 %s141_s18, 4  ;;  %s138_s26 = scalar_lea.sflag [#allocation6], %s137_s24  ;;  %s763_s4 = int_to_ptr.vmem [resolvable:$true] %s151_s4 }
  0x35   : > { %s509_s6 = scalar_lea.hbm %s761_s3, 256  ;;  %p511_p3 = pneg %p765_p11 }
  0x36   : > { %p510_p0 = scmp.ne.s32.totalorder %s761_s3, %s509_s6  ;;  %s514_s15 = scalar_lea.hbm %s863_s1, 512 }
  0x37   : > { %p515_p10 = scmp.lt.u32.totalorder %s761_s3, %s863_s1  ;;  %p516_p1 = scmp.lt.u32.totalorder %s514_s15, %s509_s6 }
  0x38   : > { %p512_p5 = pnand %p511_p3, %p510_p0  ;;  %p518_p4 = scmp.lt.u32.totalorder %s509_s6, %s761_s3 }
  0x39   : > { %p517_p2 = por %p516_p1, %p515_p10 }
  0x3a   : > { %p513_p7 = pneg %p512_p5 }
  0x3b   : > { %p519_p6 = por %p518_p4, %p517_p2 }
  0x3d   : > { %p520_p8 = pnand %p519_p6, %p513_p7 }
  0x3f   : > { %523 = shalt.err (!%p520_p8)
}
  0x40   : > { %s524_s24 = scalar_lea.vmem %s763_s4, 256  ;;  %s628_s27 = smov [#allocation5]  }
  0x41   : > { %p525_p9 = scmp.ne.s32.totalorder %s763_s4, %s524_s24  ;;  %s529_s29 = sshll.u32 %s628_s27, 4  ;;  %s530_s29 = int_to_ptr.vmem [resolvable:$false] %s529_s29 }
  0x42   : > { %s531_s30 = scalar_lea.vmem %s530_s29, 512  ;;  %p532_p5 = scmp.lt.s32.totalorder %s763_s4, %s530_s29 }
  0x43   : > { %p527_p12 = pnand %p525_p9, %p511_p3  ;;  %p533_p10 = scmp.lt.s32.totalorder %s531_s30, %s524_s24 }
  0x45   : > { %p528_p0 = pneg %p527_p12  ;;  %p534_p1 = por %p533_p10, %p532_p5 }
  0x47   : > { %p535_p2 = pnand %p534_p1, %p528_p0 }
  0x49   : > { %538 = shalt.err (!%p535_p2)
}
  0x4a   : > { %422 = dma.hbm_to_vmem [thread:$0]  (!%p765_p11), %s761_s3, 256, %s763_s4, %s138_s26  }
  0x4b   : > { %p880_p7 = scmp.ne.s32.totalorder %s873_s21, 0 }
  0x4c   : > { %p881_p3 = scmp.ne.s32.totalorder (!%p880_p7), %s869_s17, 0 }
  0x4d   : > { %160 = sbr.rel (%p880_p7) target bundleno = 319 (0x13f), region = 28 }
  0x54   : > { %592 = dma.done.wait (%p881_p3), [#allocation3], 128  }
  0x55   : > { %594 = vsyncadd (%p881_p3), [#allocation3], 4294967168  ;;  %s801_s18 = sand.u32 1, %s609_s10   ;;  %p882_p4 = scmp.ne.s32.totalorder %s871_s19, 0 }
  0x56   : > { %s397_s6 = sshll.u32 %s801_s18, 4  ;;  %s167_s5 = scalar_lea.sflag [#allocation6], %s801_s18 }
  0x57   : > { %s170_s7 = scalar_lea.vmem [#allocation5], %s397_s6 }
  0x58   : > { %596 = dma.done.wait (%p882_p4), %s167_s5, 256  }
  0x59   : > { %598 = vsyncadd (%p882_p4), %s167_s5, 4294967040  ;;  %v629_v0 = vmov 0.0   ;;  %v195_v1 = vld [vmem:[%s170_s7 + $0x8] sm:$0xff]  ;;  %v194_v2 = vld [vmem:[%s170_s7] sm:$0xff]  ;;  %vm196_vm0 = vcmask 64512   ;;  %s190_s17 = scalar_lea.vmem [#allocation7], %s397_s6 }
  0x5a   : > { %264 = vmatprep.mubr.f32.mxu0 %v629_v0  ;;  %v193_v3 = vld [vmem:[#allocation2] sm:$0xff]  ;;  %200 = vmatprep.subr.mxu0 %v195_v1  ;;  %s291_s21 = sshll.u32 %s190_s17, 4  ;;  %s406_s3 = sshll.u32 %s617_s12, 8  ;;  %vm272_vm1 = vcmask 588800   ;;  %s810_s21 = int_to_ptr.vmem [resolvable:$true] %s291_s21 }
  0x5b   : > { %201 = vmatpush1.msra.mxu0 %v194_v2  ;;  %s815_s26 = scalar_lea.hbm %s864_s2, %s406_s3  ;;  %s275_s8 = scalar_lea.sflag [#allocation4], %s801_s18 }
  0x5c   : > { %399 = vmatmul.mubr.msk.f32.vlgmr.msra.gmra.mrb[0].mxu0 %vm196_vm0, %v193_v3  ;;  %s539_s15 = scalar_lea.vmem %s810_s21, 256  ;;  %s630_s12 = smov [#allocation7]  }
  0x5d   : > { %p540_p11 = scmp.ne.s32.totalorder %s810_s21, %s539_s15  ;;  %s543_s16 = sshll.u32 %s630_s12, 4  ;;  %s544_s16 = int_to_ptr.vmem [resolvable:$false] %s543_s16 }
  0x5e   : > { %s545_s23 = scalar_lea.vmem %s544_s16, 512  ;;  %p546_p9 = scmp.lt.s32.totalorder %s810_s21, %s544_s16 }
  0x5f   : > { %p541_p6 = pnand %p540_p11, %p747_p13  ;;  %p547_p12 = scmp.lt.s32.totalorder %s545_s23, %s539_s15 }
  0x61   : > { %p542_p8 = pneg %p541_p6  ;;  %p548_p0 = por %p547_p12, %p546_p9 }
  0x63   : > { %p549_p5 = pnand %p548_p0, %p542_p8 }
 0x12f   : > { %v266_v4 = vpop.f32.mrb[0].mxu0 }
 0x130   : > { %271 = vst [vmem:[%s190_s17] sm:$0xff] %v266_v4  ;;  %v268_v5 = vpop.f32.mrb[1].mxu0 }
 0x131   : > { %273 = vst.msk [vmem:[%s190_s17 + $0x8] sm:$0xff] %vm272_vm1, %v268_v5 }
 0x132   : > { %552 = shalt.err (!%p549_p5)
}
 0x133   : > { %s553_s24 = scalar_lea.hbm %s815_s26, 256  ;;  %s557_s30 = scalar_lea.hbm %s864_s2, 512 }
 0x134   : > { %p554_p10 = scmp.ne.s32.totalorder %s815_s26, %s553_s24  ;;  %p558_p7 = scmp.lt.u32.totalorder %s815_s26, %s864_s2 }
 0x135   : > { %p559_p3 = scmp.lt.u32.totalorder %s557_s30, %s553_s24  ;;  %p561_p11 = scmp.lt.u32.totalorder %s553_s24, %s815_s26 }
 0x136   : > { %p555_p1 = pnand %p554_p10, %p747_p13 }
 0x137   : > { %p560_p4 = por %p559_p3, %p558_p7 }
 0x138   : > { %p556_p2 = pneg %p555_p1 }
 0x139   : > { %p562_p6 = por %p561_p11, %p560_p4 }
 0x13b   : > { %p563_p8 = pnand %p562_p6, %p556_p2 }
 0x13d   : > { %566 = shalt.err (!%p563_p8)
}
 0x13e   : > { %413 = dma.vmem_to_hbm [thread:$0]  (%p747_p13), %s810_s21, 256, %s815_s26, %s275_s8  }
 0x13f PF: > { %s303_s5 = sand.u32 1, %s605_s9   ;;  %p883_p9 = scmp.ne.s32.totalorder %s872_s20, 0 }
 0x140   : > { %p884_p12 = scmp.ge.s32.totalorder %s625_s14, 2  ;;  %s304_s7 = scalar_lea.sflag [#allocation4], %s303_s5 }
 0x142   : > { %p424_p0 = pnand %p884_p12, %p883_p9 }
 0x144   : > { %600 = dma.done.wait (!%p424_p0), %s304_s7, 256  }
 0x145   : > { %602 = vsyncadd (!%p424_p0), %s304_s7, 4294967040  ;;  %s19_s14 = sadd.s32 1, %s625_s14   ;;  %s885_s9 = smov %s609_s10 }
 0x146   : > { %p16_p5 = scmp.ge.s32.totalorder %s19_s14, 4   ;;  %s886_s10 = smov %s613_s11 }
 0x147   : > { %s887_s11 = smov %s755_s28  ;;  %s888_s12 = smov %s621_s13 }
 0x148   : > { %s889_s13 = smov %s891_s25  ;;  %18 = sbr.rel (!%p16_p5) target bundleno = 7 (0x7), region = 78 }
 0x14f   :  { %309 = vsyncpa [#allocation3], 1 }
 0x150   :  { %311 = vsyncpa [#allocation3 + $0x1], 1 }
 0x151   :  { %312 = vsyncpa [#allocation6], 1 }
 0x152   :  { %314 = vsyncpa [#allocation6 + $0x1], 1 }
 0x153   :  { %315 = vsyncpa [#allocation4], 1 }
 0x154   :  { %317 = vsyncpa [#allocation4 + $0x1], 1 }

</bundles_post_ra>
